<compile_context>
chip_gen: v6e
topology: v6e:2x2x1
jax: 0.10.0
libtpu: 0.0.40
codegen_flags: <defaults>
</compile_context>

<pallas_src>
import functools

import jax
import jax.numpy as jnp
from jax.experimental import pallas as pl
from jax.experimental.pallas import tpu as pltpu


def _round_up(x, m):
    return (x + m - 1) // m * m


def ppo_fused_kernel(xT_ref, w1T_ref, b1_ref, w2T_ref, b2_ref, whT_ref, bh_ref,
                     out_ref, *, action_size):
    """All operands are transposed: batch on lanes, features on sublanes."""
    compute_dtype = w1T_ref.dtype
    xT = xT_ref[...]                                        # (SP, TB)

    # fc1 + relu:  h1^T = W1^T @ x^T + b1   -> (HP, TB), f32 accumulation
    h1 = jnp.dot(w1T_ref[...], xT, preferred_element_type=jnp.float32) + b1_ref[...]
    h1 = jnp.maximum(h1, 0.0)

    # fc2 + relu
    h2 = jnp.dot(w2T_ref[...], h1.astype(compute_dtype),
                 preferred_element_type=jnp.float32) + b2_ref[...]
    h2 = jnp.maximum(h2, 0.0)

    # Fused head: rows [0:A] = actor logits, row A = critic value, rest = zero
    # padding (zero weights / zero bias -> numerically inert).
    head = jnp.dot(whT_ref[...], h2.astype(compute_dtype),
                   preferred_element_type=jnp.float32) + bh_ref[...]   # (OP, TB)

    row = jax.lax.broadcasted_iota(jnp.int32, head.shape, dimension=0)
    is_logit = row < action_size

    # Numerically stable softmax over the A logit rows only (padding -> -1e30).
    masked = jnp.where(is_logit, head, jnp.float32(-1e30))
    m = jnp.max(masked, axis=0, keepdims=True)              # (1, TB) sublane reduce
    e = jnp.exp(masked - m)                                 # padded rows -> 0
    denom = jnp.sum(e, axis=0, keepdims=True)
    probs = e / denom                                       # exact normalization

    # Lane-dense (OP, TB) output: rows [0:A]=probs, row A=value, rest 0.
    out = jnp.where(is_logit, probs,
                    jnp.where(row == action_size, head, 0.0))
    out_ref[...] = out.astype(out_ref.dtype)


def prepare_params(params, *, compute_dtype=jnp.float32):
    """Transpose / pad / cast weights ONCE (keep out of the per-step forward)."""
    w1, b1 = params["fc1"]
    w2, b2 = params["fc2"]
    wa, ba = params["actor"]
    wc, bc = params["critic"]

    S, H = w1.shape
    A = wa.shape[1]
    SP = _round_up(S, 8)          # state features  (sublane axis of x^T)
    HP = _round_up(H, 8)          # hidden width    (sublane axis of h^T)
    OP = _round_up(A + 1, 8)      # fused head rows (actor logits + critic value)

    w1T = jnp.pad(w1.T, ((0, HP - H), (0, SP - S))).astype(compute_dtype)   # (HP, SP)
    b1p = jnp.pad(b1, (0, HP - H)).reshape(HP, 1).astype(jnp.float32)
    w2T = jnp.pad(w2.T, ((0, HP - H), (0, HP - H))).astype(compute_dtype)   # (HP, HP)
    b2p = jnp.pad(b2, (0, HP - H)).reshape(HP, 1).astype(jnp.float32)

    wh = jnp.concatenate([wa, wc], axis=1)                                  # (H, A+1)
    bh = jnp.concatenate([ba, bc], axis=0)                                  # (A+1,)
    whT = jnp.pad(wh.T, ((0, OP - (A + 1)), (0, HP - H))).astype(compute_dtype)
    bhp = jnp.pad(bh, (0, OP - (A + 1))).reshape(OP, 1).astype(jnp.float32)

    return (w1T, b1p, w2T, b2p, whT, bhp)


def _choose_batch_tile(B):
    """Lane-axis batch tile: multiple of 128, >=2 grid steps for mid/large B
    (v7x dual-TC sharding), capped at 2048 (VMEM-safe on all generations)."""
    bp128 = _round_up(B, 128)
    if bp128 <= 256:
        return bp128
    return min(2048, _round_up((bp128 + 1) // 2, 128))


def ppo_forward(x, packed, *, action_size, block_b=None):
    """x: [B, state_size] float32. packed: output of prepare_params."""
    w1T, b1, w2T, b2, whT, bh = packed
    B, S = x.shape
    HP, SP = w1T.shape
    OP = whT.shape[0]
    compute_dtype = w1T.dtype

    if block_b is None:
        TB = _choose_batch_tile(B)
    else:
        TB = min(4096, _round_up(block_b, 128))
    Bp = _round_up(B, TB)
    nb = Bp // TB

    # Batch on the lane axis, state features on the sublane axis.
    # Padded batch columns (lanes >= B) carry finite garbage (bias -> relu ->
    # softmax); they are sliced off below and never read.
    xT = jnp.pad(x, ((0, Bp - B), (0, SP - S))).T.astype(compute_dtype)     # (SP, Bp)

    resident = lambda shape: pl.BlockSpec(shape, lambda i: (0, 0))

    out_pad = pl.pallas_call(
        functools.partial(ppo_fused_kernel, action_size=action_size),
        out_shape=jax.ShapeDtypeStruct((OP, Bp), jnp.float32),
        grid=(nb,),
        in_specs=[
            pl.BlockSpec((SP, TB), lambda i: (0, i)),   # x^T batch tile
            resident((HP, SP)), resident((HP, 1)),      # fc1
            resident((HP, HP)), resident((HP, 1)),      # fc2
            resident((OP, HP)), resident((OP, 1)),      # fused actor|critic head
        ],
        out_specs=pl.BlockSpec((OP, TB), lambda i: (0, i)),
        compiler_params=pltpu.CompilerParams(
            dimension_semantics=("parallel",),
            vmem_limit_bytes=32 * 1024 * 1024),
    )(xT, w1T, b1, w2T, b2, whT, bh)

    probs = out_pad[:action_size, :B].T                     # (B, A)
    value = out_pad[action_size:action_size + 1, :B].T      # (B, 1)
    return probs, value


def init_params(key, state_size, action_size, hidden_size=64):
    """PyTorch nn.Linear-style init (U[-1/sqrt(fan_in), 1/sqrt(fan_in)])."""
    def linear(k, fan_in, fan_out):
        kw, kb = jax.random.split(k)
        bound = 1.0 / jnp.sqrt(fan_in)
        w = jax.random.uniform(kw, (fan_in, fan_out), jnp.float32, -bound, bound)
        b = jax.random.uniform(kb, (fan_out,), jnp.float32, -bound, bound)
        return w, b

    k1, k2, k3, k4 = jax.random.split(key, 4)
    return {
        "fc1": linear(k1, state_size, hidden_size),
        "fc2": linear(k2, hidden_size, hidden_size),
        "actor": linear(k3, hidden_size, action_size),
        "critic": linear(k4, hidden_size, 1),
    }


def ppo_forward_ref(x, params):
    """Pure-JAX reference for verification."""
    w1, b1 = params["fc1"]
    w2, b2 = params["fc2"]
    wa, ba = params["actor"]
    wc, bc = params["critic"]
    h1 = jnp.maximum(x @ w1 + b1, 0.0)
    h2 = jnp.maximum(h1 @ w2 + b2, 0.0)
    probs = jax.nn.softmax(h2 @ wa + ba, axis=-1)
    value = h2 @ wc + bc
    return probs, value


if __name__ == "__main__":
    # Grid-world-style sizes: state = flattened small grid, 4 discrete actions.
    B, STATE, ACTION, HIDDEN = 8, 16, 4, 64

    key = jax.random.PRNGKey(0)
    kx, kp = jax.random.split(key)
    x = jax.random.normal(kx, (B, STATE), dtype=jnp.float32)
    params = init_params(kp, STATE, ACTION, HIDDEN)

    # Prepare (transpose/pad/cast) weights once; reuse across every forward call.
    packed = prepare_params(params, compute_dtype=jnp.float32)

    fwd = jax.jit(functools.partial(ppo_forward, action_size=ACTION))
    probs, value = fwd(x, packed)
    jax.block_until_ready((probs, value))

    probs_ref, value_ref = ppo_forward_ref(x, params)
    assert probs.shape == (B, ACTION) and value.shape == (B, 1)
    assert jnp.allclose(probs, probs_ref, atol=1e-5, rtol=1e-5)
    assert jnp.allclose(value, value_ref, atol=1e-5, rtol=1e-5)
    assert jnp.allclose(jnp.sum(probs, axis=-1), 1.0, atol=1e-5)

    print("KERNEL_OK")
</pallas_src>

<mosaic_0001>
module attributes {stable_mosaic.version = 11 : i64} {
  func.func @ppo_fused_kernel(%arg0: i32, %arg1: memref<16x128xf32, #tpu.memory_space<vmem>>, %arg2: memref<64x16xf32, #tpu.memory_space<vmem>>, %arg3: memref<64x1xf32, #tpu.memory_space<vmem>>, %arg4: memref<64x64xf32, #tpu.memory_space<vmem>>, %arg5: memref<64x1xf32, #tpu.memory_space<vmem>>, %arg6: memref<8x64xf32, #tpu.memory_space<vmem>>, %arg7: memref<8x1xf32, #tpu.memory_space<vmem>>, %arg8: memref<8x128xf32, #tpu.memory_space<vmem>>) attributes {dimension_semantics = [#tpu.dimension_semantics<parallel>], iteration_bounds = array<i64: 1>, scalar_prefetch = 0 : i64, scratch_operands = 0 : i64, tpu.core_type = #tpu.core_type<tc>, window_params = [{transform_indices = @transform_0, window_bounds = array<i64: 16, 128>}, {pipeline_mode = #tpu.pipeline_mode<synchronous>, transform_indices = @transform_1, window_bounds = array<i64: 64, 16>}, {pipeline_mode = #tpu.pipeline_mode<synchronous>, transform_indices = @transform_2, window_bounds = array<i64: 64, 1>}, {pipeline_mode = #tpu.pipeline_mode<synchronous>, transform_indices = @transform_3, window_bounds = array<i64: 64, 64>}, {pipeline_mode = #tpu.pipeline_mode<synchronous>, transform_indices = @transform_4, window_bounds = array<i64: 64, 1>}, {pipeline_mode = #tpu.pipeline_mode<synchronous>, transform_indices = @transform_5, window_bounds = array<i64: 8, 64>}, {pipeline_mode = #tpu.pipeline_mode<synchronous>, transform_indices = @transform_6, window_bounds = array<i64: 8, 1>}, {transform_indices = @transform_7, window_bounds = array<i64: 8, 128>}]} {
    %c0 = arith.constant 0 : index
    %c0_0 = arith.constant 0 : index
    %0 = vector.load %arg1[%c0, %c0_0] : memref<16x128xf32, #tpu.memory_space<vmem>>, vector<16x128xf32>
    %c0_1 = arith.constant 0 : index
    %c0_2 = arith.constant 0 : index
    %1 = vector.load %arg2[%c0_1, %c0_2] : memref<64x16xf32, #tpu.memory_space<vmem>>, vector<64x16xf32>
    %cst = arith.constant dense<0.000000e+00> : vector<64x128xf32>
    %2 = tpu.matmul %1, %0, %cst {dimension_numbers = #tpu.dot_dimension_numbers<[1], [0], [0], [1], [0, 0, 1, 1], [], []>} : vector<64x16xf32>, vector<16x128xf32>, vector<64x128xf32> -> vector<64x128xf32>
    %c0_3 = arith.constant 0 : index
    %c0_4 = arith.constant 0 : index
    %3 = vector.load %arg3[%c0_3, %c0_4] : memref<64x1xf32, #tpu.memory_space<vmem>>, vector<64x1xf32>
    %4 = vector.broadcast %3 : vector<64x1xf32> to vector<64x128xf32>
    %5 = arith.addf %2, %4 : vector<64x128xf32>
    %cst_5 = arith.constant 0.000000e+00 : f32
    %6 = vector.broadcast %cst_5 : f32 to vector<64x128xf32>
    %7 = arith.maximumf %5, %6 : vector<64x128xf32>
    %c0_6 = arith.constant 0 : index
    %c0_7 = arith.constant 0 : index
    %8 = vector.load %arg4[%c0_6, %c0_7] : memref<64x64xf32, #tpu.memory_space<vmem>>, vector<64x64xf32>
    %cst_8 = arith.constant dense<0.000000e+00> : vector<64x128xf32>
    %9 = tpu.matmul %8, %7, %cst_8 {dimension_numbers = #tpu.dot_dimension_numbers<[1], [0], [0], [1], [0, 0, 1, 1], [], []>} : vector<64x64xf32>, vector<64x128xf32>, vector<64x128xf32> -> vector<64x128xf32>
    %c0_9 = arith.constant 0 : index
    %c0_10 = arith.constant 0 : index
    %10 = vector.load %arg5[%c0_9, %c0_10] : memref<64x1xf32, #tpu.memory_space<vmem>>, vector<64x1xf32>
    %11 = vector.broadcast %10 : vector<64x1xf32> to vector<64x128xf32>
    %12 = arith.addf %9, %11 : vector<64x128xf32>
    %cst_11 = arith.constant 0.000000e+00 : f32
    %13 = vector.broadcast %cst_11 : f32 to vector<64x128xf32>
    %14 = arith.maximumf %12, %13 : vector<64x128xf32>
    %c0_12 = arith.constant 0 : index
    %c0_13 = arith.constant 0 : index
    %15 = vector.load %arg6[%c0_12, %c0_13] : memref<8x64xf32, #tpu.memory_space<vmem>>, vector<8x64xf32>
    %cst_14 = arith.constant dense<0.000000e+00> : vector<8x128xf32>
    %16 = tpu.matmul %15, %14, %cst_14 {dimension_numbers = #tpu.dot_dimension_numbers<[1], [0], [0], [1], [0, 0, 1, 1], [], []>} : vector<8x64xf32>, vector<64x128xf32>, vector<8x128xf32> -> vector<8x128xf32>
    %c0_15 = arith.constant 0 : index
    %c0_16 = arith.constant 0 : index
    %17 = vector.load %arg7[%c0_15, %c0_16] : memref<8x1xf32, #tpu.memory_space<vmem>>, vector<8x1xf32>
    %18 = vector.broadcast %17 : vector<8x1xf32> to vector<8x128xf32>
    %19 = arith.addf %16, %18 : vector<8x128xf32>
    %20 = tpu.iota {dimensions = array<i32: 0>} : vector<8x128xi32>
    %c4_i32 = arith.constant 4 : i32
    %21 = vector.broadcast %c4_i32 : i32 to vector<8x128xi32>
    %22 = arith.cmpi slt, %20, %21 : vector<8x128xi32>
    %cst_17 = arith.constant -1.000000e+30 : f32
    %23 = vector.broadcast %cst_17 : f32 to vector<8x128xf32>
    %24 = arith.select %22, %19, %23 : vector<8x128xi1>, vector<8x128xf32>
    %cst_18 = arith.constant dense<0xFF800000> : vector<128xf32>
    %25 = vector.multi_reduction <maximumf>, %24, %cst_18 [0] : vector<8x128xf32> to vector<128xf32>
    %26 = vector.shape_cast %25 : vector<128xf32> to vector<1x128xf32>
    %27 = vector.broadcast %26 : vector<1x128xf32> to vector<8x128xf32>
    %28 = arith.subf %24, %27 : vector<8x128xf32>
    %29 = math.exp %28 : vector<8x128xf32>
    %cst_19 = arith.constant dense<0.000000e+00> : vector<128xf32>
    %30 = vector.multi_reduction <add>, %29, %cst_19 [0] : vector<8x128xf32> to vector<128xf32>
    %31 = vector.shape_cast %30 : vector<128xf32> to vector<1x128xf32>
    %32 = vector.broadcast %31 : vector<1x128xf32> to vector<8x128xf32>
    %33 = arith.divf %29, %32 : vector<8x128xf32>
    %c4_i32_20 = arith.constant 4 : i32
    %34 = vector.broadcast %c4_i32_20 : i32 to vector<8x128xi32>
    %35 = arith.cmpi eq, %20, %34 : vector<8x128xi32>
    %cst_21 = arith.constant 0.000000e+00 : f32
    %36 = vector.broadcast %cst_21 : f32 to vector<8x128xf32>
    %37 = arith.select %35, %19, %36 : vector<8x128xi1>, vector<8x128xf32>
    %38 = arith.select %22, %33, %37 : vector<8x128xi1>, vector<8x128xf32>
    %c0_22 = arith.constant 0 : index
    %c0_23 = arith.constant 0 : index
    %39 = vector.load %arg8[%c0_22, %c0_23] : memref<8x128xf32, #tpu.memory_space<vmem>>, vector<8x128xf32>
    tpu.vector_store %arg8[%c0_22, %c0_23], %38 {strides = array<i32>} : memref<8x128xf32, #tpu.memory_space<vmem>>, vector<8x128xf32>,
    return
  }
  func.func @transform_0(%arg0: i32) -> (i32, i32) {
    %c0_i32 = arith.constant 0 : i32
    %c0_i32_0 = arith.constant 0 : i32
    return %c0_i32, %arg0 : i32, i32
  }
  func.func @transform_1(%arg0: i32) -> (i32, i32) {
    %c0_i32 = arith.constant 0 : i32
    %c0_i32_0 = arith.constant 0 : i32
    %c0_i32_1 = arith.constant 0 : i32
    return %c0_i32, %c0_i32_0 : i32, i32
  }
  func.func @transform_2(%arg0: i32) -> (i32, i32) {
    %c0_i32 = arith.constant 0 : i32
    %c0_i32_0 = arith.constant 0 : i32
    %c0_i32_1 = arith.constant 0 : i32
    return %c0_i32, %c0_i32_0 : i32, i32
  }
  func.func @transform_3(%arg0: i32) -> (i32, i32) {
    %c0_i32 = arith.constant 0 : i32
    %c0_i32_0 = arith.constant 0 : i32
    %c0_i32_1 = arith.constant 0 : i32
    return %c0_i32, %c0_i32_0 : i32, i32
  }
  func.func @transform_4(%arg0: i32) -> (i32, i32) {
    %c0_i32 = arith.constant 0 : i32
    %c0_i32_0 = arith.constant 0 : i32
    %c0_i32_1 = arith.constant 0 : i32
    return %c0_i32, %c0_i32_0 : i32, i32
  }
  func.func @transform_5(%arg0: i32) -> (i32, i32) {
    %c0_i32 = arith.constant 0 : i32
    %c0_i32_0 = arith.constant 0 : i32
    %c0_i32_1 = arith.constant 0 : i32
    return %c0_i32, %c0_i32_0 : i32, i32
  }
  func.func @transform_6(%arg0: i32) -> (i32, i32) {
    %c0_i32 = arith.constant 0 : i32
    %c0_i32_0 = arith.constant 0 : i32
    %c0_i32_1 = arith.constant 0 : i32
    return %c0_i32, %c0_i32_0 : i32, i32
  }
  func.func @transform_7(%arg0: i32) -> (i32, i32) {
    %c0_i32 = arith.constant 0 : i32
    %c0_i32_0 = arith.constant 0 : i32
    return %c0_i32, %arg0 : i32, i32
  }
}

</mosaic_0001>

<bundles_post_ra>
// kernel: ppo_forward.1
= control target key start
LH: loop header
LB: loop body
LE: loop exit
PB: predicated region body
PF: predicated region fallthrough
CT: control target
= control target key end

     0   :  { %vm84_vm0 = vcmask 130048   ;;  %v649_v3 = vmov 0   ;;  %vm278_vm1 = vcmask 523264   ;;  %vm651_vm2 = vmmov 0   ;;  %s822_s0 = inlined_call_operand.vmem [shape: f32[16,128], index: 0, kind: input, shape index: {}]   ;;  %s823_s1 = inlined_call_operand.vmem [shape: f32[64,16], index: 1, kind: input, shape index: {}]   ;;  %s824_s2 = inlined_call_operand.vmem [shape: f32[64,1], index: 2, kind: input, shape index: {}]   ;;  %s825_s4 = inlined_call_operand.vmem [shape: f32[64,1], index: 4, kind: input, shape index: {}]   ;;  %s826_s6 = inlined_call_operand.vmem [shape: f32[8,1], index: 6, kind: input, shape index: {}]   ;;  %s827_s3 = inlined_call_operand.vmem [shape: f32[64,64], index: 3, kind: input, shape index: {}]   ;;  %s828_s5 = inlined_call_operand.vmem [shape: f32[8,64], index: 5, kind: input, shape index: {}]   ;;  %s829_s7 = inlined_call_operand.vmem [shape: f32[8,128], index: 7, kind: output, shape index: {}]  }
   0x1   :  { %v27_v0 = vld [vmem:[%s822_s0 + $0x8] sm:$0xff]  ;;  %v26_v1 = vld [vmem:[%s822_s0] sm:$0xff]  ;;  %643 = vset.pattern.permute.xlu0 %v649_v3  ;;  %644 = vset.pattern.permute.xlu1 %v649_v3  ;;  %v30_v5 = vld [vmem:[%s823_s1 + $0x10] sm:$0xff] }
   0x2   :  { %v28_v2 = vld [vmem:[%s823_s1] sm:$0xff]  ;;  %577 = vmatprep.subr.mxu0 %v27_v0  ;;  %v29_v4 = vld [vmem:[%s823_s1 + $0x8] sm:$0xff]  ;;  %v43_v6 = vld [vmem:[%s824_s2 + $0x38] sm:$0xff] }
   0x3   :  { %581 = vmatprep.mubr.msk.f32.mxu0 %vm84_vm0, %v28_v2  ;;  %578 = vmatpush3.msra.mxu0 %v27_v0  ;;  %v41_v7 = vld [vmem:[%s824_s2 + $0x28] sm:$0xff]  ;;  %v42_v8 = vld [vmem:[%s824_s2 + $0x30] sm:$0xff]  ;;  %v31_v9 = vld [vmem:[%s823_s1 + $0x18] sm:$0xff] }
   0x4   :  { %579 = vmatprep.subr.mxu0 %v26_v1  ;;  %81 = vperm.xlu0 %643, %v43_v6   ;;  %v40_v10 = vld [vmem:[%s824_s2 + $0x20] sm:$0xff]  ;;  %v39_v12 = vld [vmem:[%s824_s2 + $0x18] sm:$0xff]  ;;  %v33_v13 = vld [vmem:[%s823_s1 + $0x28] sm:$0xff] }
   0x5   :  { %580 = vmatpush3.msra.mxu0 %v26_v1  ;;  %71 = vperm.xlu1 %644, %v41_v7   ;;  %v32_v11 = vld [vmem:[%s823_s1 + $0x20] sm:$0xff]  ;;  %v38_v14 = vld [vmem:[%s824_s2 + $0x10] sm:$0xff]  ;;  %v37_v16 = vld [vmem:[%s824_s2 + $0x8] sm:$0xff] }
   0x6   :  { %582 = vmatmul.mubr.msk.f32.vlgmr.msra.gmra.mxu0 %vm84_vm0, %v29_v4  ;;  %v34_v15 = vld [vmem:[%s823_s1 + $0x30] sm:$0xff]  ;;  %v35_v17 = vld [vmem:[%s823_s1 + $0x38] sm:$0xff]  ;;  %v36_v18 = vld [vmem:[%s824_s2] sm:$0xff]  ;;  %v650_v4 = vmov 0.0  }
   0x7   :  { %584 = vmatprep.mubr.msk.f32.mxu0 %vm84_vm0, %v30_v5  ;;  %v237_v19 = vld [vmem:[%s825_s4 + $0x38] sm:$0xff]  ;;  %v236_v20 = vld [vmem:[%s825_s4 + $0x30] sm:$0xff]  ;;  %v235_v21 = vld [vmem:[%s825_s4 + $0x28] sm:$0xff]  ;;  %621 = vmatprep.subr.mxu0 %v650_v4 }
   0x8   :  { %76 = vperm.xlu0 %643, %v42_v8   ;;  %v234_v22 = vld [vmem:[%s825_s4 + $0x20] sm:$0xff]  ;;  %v233_v23 = vld [vmem:[%s825_s4 + $0x18] sm:$0xff]  ;;  %v232_v24 = vld [vmem:[%s825_s4 + $0x10] sm:$0xff] }
   0x9   :  { %66 = vperm.xlu1 %644, %v40_v10   ;;  %v231_v25 = vld [vmem:[%s825_s4 + $0x8] sm:$0xff]  ;;  %v230_v26 = vld [vmem:[%s825_s4] sm:$0xff]  ;;  %v224_v62 = vld [vmem:[%s827_s3 + $0x10] sm:$0xff] }
   0xa   :  { %585 = vmatmul.mubr.msk.f32.gmra.mxu0 %vm84_vm0, %v31_v9  ;;  %v417_v27 = vld [vmem:[%s826_s6] sm:$0xff]  ;;  %v223_v61 = vld [vmem:[%s827_s3 + $0x8] sm:$0xff]  ;;  %v225_v63 = vld [vmem:[%s827_s3 + $0x18] sm:$0xff] }
   0xb   :  { %587 = vmatprep.mubr.msk.f32.mxu0 %vm84_vm0, %v32_v11  ;;  %v222_v28 = vld [vmem:[%s827_s3] sm:$0xff]  ;;  %v227_v1 = vld [vmem:[%s827_s3 + $0x28] sm:$0xff]  ;;  %v228_v2 = vld [vmem:[%s827_s3 + $0x30] sm:$0xff] }
   0xc   :  { %61 = vperm.xlu0 %643, %v39_v12   ;;  %609 = vmatprep.mubr.msk.f32.mxu1 %vm278_vm1, %v222_v28  ;;  %v226_v0 = vld [vmem:[%s827_s3 + $0x20] sm:$0xff]  ;;  %v229_v3 = vld [vmem:[%s827_s3 + $0x38] sm:$0xff] }
   0xd   :  { %56 = vperm.xlu1 %644, %v38_v14  }
   0xe   :  { %588 = vmatmul.mubr.msk.f32.gmra.mxu0 %vm84_vm0, %v33_v13 }
   0xf   :  { %590 = vmatprep.mubr.msk.f32.mxu0 %vm84_vm0, %v34_v15 }
  0x10   :  { %51 = vperm.xlu0 %643, %v37_v16  }
  0x11   :  { %46 = vperm.xlu1 %644, %v36_v18  }
  0x12   :  { %591 = vmatmul.mubr.msk.f32.gmra.mxu0 %vm84_vm0, %v35_v17 }
  0x13   :  { %637 = vmatprep.mubr.msk.f32.mxu0 %vm651_vm2, %v650_v4 }
  0x14   :  { %275 = vperm.xlu0 %643, %v237_v19  }
  0x15   :  { %270 = vperm.xlu1 %644, %v236_v20  }
  0x18   :  { %265 = vperm.xlu0 %643, %v235_v21  }
  0x19   :  { %260 = vperm.xlu1 %644, %v234_v22  }
  0x1c   :  { %255 = vperm.xlu0 %643, %v233_v23  }
  0x1d   :  { %250 = vperm.xlu1 %644, %v232_v24  }
  0x20   :  { %245 = vperm.xlu0 %643, %v231_v25  }
  0x21   :  { %240 = vperm.xlu1 %644, %v230_v26  }
  0x24   :  { %420 = vperm.xlu0 %643, %v417_v27  }
  0x7f   :  { %v82_v31 = vpop.permute.xlu0 %81 }
  0x80   :  { %v72_v33 = vpop.permute.xlu1 %71 }
  0x83   :  { %v77_v36 = vpop.permute.xlu0 %76 }
  0x84   :  { %v67_v38 = vpop.permute.xlu1 %66 }
  0x87   :  { %v62_v45 = vpop.permute.xlu0 %61 }
  0x88   :  { %v57_v48 = vpop.permute.xlu1 %56 }
  0x8b   :  { %v52_v53 = vpop.permute.xlu0 %51 }
  0x8c   :  { %v47_v56 = vpop.permute.xlu1 %46 }
  0x8f   :  { %v276_v7 = vpop.permute.xlu0 %275 }
  0x90   :  { %v271_v9 = vpop.permute.xlu1 %270 }
  0x93   :  { %v266_v12 = vpop.permute.xlu0 %265 }
  0x94   :  { %v261_v14 = vpop.permute.xlu1 %260 }
  0x97   :  { %v256_v21 = vpop.permute.xlu0 %255 }
  0x98   :  { %v251_v24 = vpop.permute.xlu1 %250 }
  0xc6   :  { %v583_v29 = vpop.f32.mrf.mxu0 }
  0xc7   :  { %v181_v54 = vadd.f32 %v583_v29, %v52_v53  ;;  %v246_v29 = vpop.permute.xlu0 %245 }
  0xc8   :  { %v175_v30 = vpop.f32.mrf.mxu0 }
  0xc9   :  { %v176_v57 = vadd.f32 %v175_v30, %v47_v56  ;;  %v215_v59 = vmax.f32 %v181_v54, 0.0 }
  0xca   :  { %v586_v32 = vpop.f32.mrf.mxu0 }
  0xcb   :  { %v191_v49 = vadd.f32 %v586_v32, %v62_v45  ;;  %v214_v60 = vmax.f32 %v176_v57, 0.0  ;;  %v241_v32 = vpop.permute.xlu1 %240 }
  0xcc   :  { %v185_v34 = vpop.f32.mrf.mxu0 }
  0xcd   :  { %v186_v51 = vadd.f32 %v185_v34, %v57_v48  ;;  %v217_v55 = vmax.f32 %v191_v49, 0.0 }
  0xce   :  { %v589_v35 = vpop.f32.mrf.mxu0 }
  0xcf   :  { %v201_v42 = vadd.f32 %v589_v35, %v72_v33  ;;  %v216_v58 = vmax.f32 %v186_v51, 0.0 }
  0xd0   :  { %v195_v37 = vpop.f32.mrf.mxu0 }
  0xd1   :  { %v196_v46 = vadd.f32 %v195_v37, %v67_v38  ;;  %v219_v50 = vmax.f32 %v201_v42, 0.0  ;;  %v416_v37 = vld [vmem:[%s828_s5] sm:$0xff]  ;;  %v496_v38 = vlaneseq }
  0xd2   :  { %v592_v39 = vpop.f32.mrf.mxu0 }
  0xd3   :  { %v211_v40 = vadd.f32 %v592_v39, %v82_v31  ;;  %v218_v52 = vmax.f32 %v196_v46, 0.0  ;;  %v497_v39 = vshrl.u32 %v496_v38, 7 }
  0xd4   :  { %v205_v41 = vpop.f32.mrf.mxu0 }
  0xd5   :  { %v221_v43 = vmax.f32 %v211_v40, 0.0  ;;  %v206_v44 = vadd.f32 %v205_v41, %v77_v36  ;;  %v421_v40 = vpop.permute.xlu0 %420  ;;  %vm498_vm3 = vcmp.lt.s32.totalorder %v497_v39, 4  ;;  %vm517_vm4 = vcmp.eq.s32.totalorder %v497_v39, 4 }
  0xd7   :  { %v220_v47 = vmax.f32 %v206_v44, 0.0  ;;  %593 = vmatprep.subr.mxu1 %v221_v43 }
  0xd8   :  { %594 = vmatpush3.msra.mxu1 %v221_v43 }
  0xd9   :  { %595 = vmatprep.subr.mxu1 %v220_v47 }
  0xda   :  { %596 = vmatpush3.msra.mxu1 %v220_v47 }
  0xdb   :  { %597 = vmatprep.subr.mxu1 %v219_v50 }
  0xdc   :  { %598 = vmatpush3.msra.mxu1 %v219_v50 }
  0xdd   :  { %599 = vmatprep.subr.mxu1 %v218_v52 }
  0xde   :  { %600 = vmatpush3.msra.mxu1 %v218_v52 }
  0xdf   :  { %601 = vmatprep.subr.mxu1 %v217_v55 }
  0xe0   :  { %602 = vmatpush3.msra.mxu1 %v217_v55 }
  0xe1   :  { %603 = vmatprep.subr.mxu1 %v216_v58 }
  0xe2   :  { %604 = vmatpush3.msra.mxu1 %v216_v58 }
  0xe3   :  { %605 = vmatprep.subr.mxu1 %v215_v59 }
  0xe4   :  { %606 = vmatpush3.msra.mxu1 %v215_v59 }
  0xe5   :  { %607 = vmatprep.subr.mxu1 %v214_v60 }
  0xe6   :  { %608 = vmatpush3.msra.mxu1 %v214_v60 }
  0xe7   :  { %610 = vmatmul.mubr.msk.f32.vlgmr.msra.gmra.mxu1 %vm278_vm1, %v223_v61 }
  0xe8   :  { %612 = vmatprep.mubr.msk.f32.mxu1 %vm278_vm1, %v224_v62 }
  0xeb   :  { %613 = vmatmul.mubr.msk.f32.gmra.mxu1 %vm278_vm1, %v225_v63 }
  0xec   :  { %615 = vmatprep.mubr.msk.f32.mxu1 %vm278_vm1, %v226_v0 }
  0xef   :  { %616 = vmatmul.mubr.msk.f32.gmra.mxu1 %vm278_vm1, %v227_v1 }
  0xf0   :  { %618 = vmatprep.mubr.msk.f32.mxu1 %vm278_vm1, %v228_v2 }
  0xf3   :  { %619 = vmatmul.mubr.msk.f32.gmra.mxu1 %vm278_vm1, %v229_v3 }
 0x1a7   :  { %v611_v5 = vpop.f32.mrf.mxu1 }
 0x1a8   :  { %v375_v30 = vadd.f32 %v611_v5, %v246_v29 }
 0x1a9   :  { %v369_v6 = vpop.f32.mrf.mxu1 }
 0x1aa   :  { %v370_v33 = vadd.f32 %v369_v6, %v241_v32  ;;  %v409_v35 = vmax.f32 %v375_v30, 0.0 }
 0x1ab   :  { %v614_v8 = vpop.f32.mrf.mxu1 }
 0x1ac   :  { %v385_v25 = vadd.f32 %v614_v8, %v256_v21  ;;  %v408_v36 = vmax.f32 %v370_v33, 0.0 }
 0x1ad   :  { %v379_v10 = vpop.f32.mrf.mxu1 }
 0x1ae   :  { %v380_v27 = vadd.f32 %v379_v10, %v251_v24  ;;  %v411_v31 = vmax.f32 %v385_v25, 0.0 }
 0x1af   :  { %v617_v11 = vpop.f32.mrf.mxu1 }
 0x1b0   :  { %v395_v18 = vadd.f32 %v617_v11, %v266_v12  ;;  %v410_v34 = vmax.f32 %v380_v27, 0.0 }
 0x1b1   :  { %v389_v13 = vpop.f32.mrf.mxu1 }
 0x1b2   :  { %v390_v22 = vadd.f32 %v389_v13, %v261_v14  ;;  %v413_v26 = vmax.f32 %v395_v18, 0.0 }
 0x1b3   :  { %v620_v15 = vpop.f32.mrf.mxu1 }
 0x1b4   :  { %v405_v16 = vadd.f32 %v620_v15, %v276_v7  ;;  %v412_v28 = vmax.f32 %v390_v22, 0.0 }
 0x1b5   :  { %v399_v17 = vpop.f32.mrf.mxu1 }
 0x1b6   :  { %v415_v19 = vmax.f32 %v405_v16, 0.0  ;;  %v400_v20 = vadd.f32 %v399_v17, %v271_v9 }
 0x1b8   :  { %v414_v23 = vmax.f32 %v400_v20, 0.0  ;;  %622 = vmatpush3.msra.mxu0 %v415_v19 }
 0x1b9   :  { %623 = vmatprep.subr.mxu0 %v650_v4 }
 0x1ba   :  { %624 = vmatpush3.msra.mxu0 %v414_v23 }
 0x1bb   :  { %625 = vmatprep.subr.mxu0 %v650_v4 }
 0x1bc   :  { %626 = vmatpush3.msra.mxu0 %v413_v26 }
 0x1bd   :  { %627 = vmatprep.subr.mxu0 %v650_v4 }
 0x1be   :  { %628 = vmatpush3.msra.mxu0 %v412_v28 }
 0x1bf   :  { %629 = vmatprep.subr.mxu0 %v650_v4 }
 0x1c0   :  { %630 = vmatpush3.msra.mxu0 %v411_v31 }
 0x1c1   :  { %631 = vmatprep.subr.mxu0 %v650_v4 }
 0x1c2   :  { %632 = vmatpush3.msra.mxu0 %v410_v34 }
 0x1c3   :  { %633 = vmatprep.subr.mxu0 %v650_v4 }
 0x1c4   :  { %634 = vmatpush3.msra.mxu0 %v409_v35 }
 0x1c5   :  { %635 = vmatprep.subr.mxu0 %v650_v4 }
 0x1c6   :  { %636 = vmatpush3.msra.mxu0 %v408_v36 }
 0x1c7   :  { %638 = vmatmul.mubr.msk.f32.vlgmr.msra.gmra.mxu0 %vm278_vm1, %v416_v37 }
 0x287   :  { %v492_v41 = vpop.f32.mrf.mxu0 }
 0x288   :  { %v493_v42 = vadd.f32 %v492_v41, %v421_v40 }
 0x289   :  { %v639_v43 = vpop.f32.mrf.mxu0 }
 0x28a   :  { %v499_v44 = vsel %vm498_vm3, %v493_v42, -1e+30  ;;  %v518_v62 = vsel %vm517_vm4, %v493_v42, 0.0 }
 0x28b   :  { %v500_v45 = vrot.slane %v499_v44, 4 }
 0x28d   :  { %v501_v46 = vmax.f32 %v499_v44, %v500_v45 }
 0x28f   :  { %v502_v47 = vrot.slane %v501_v46, 2 }
 0x291   :  { %v503_v48 = vmax.f32 %v501_v46, %v502_v47 }
 0x293   :  { %v504_v49 = vrot.slane %v503_v48, 1 }
 0x295   :  { %v505_v50 = vmax.f32 %v503_v48, %v504_v49 }
 0x297   :  { %v506_v51 = vsub.f32 %v499_v44, %v505_v50 }
 0x299   :  { %v507_v52 = vmul.f32 1.442695, %v506_v51 }
 0x29b   :  { %645 = vpow2.f32 %v507_v52 }
 0x2a8   :  { %v646_v53 = vpop.eup %645 }
 0x2a9   :  { %v509_v54 = vrot.slane %v646_v53, 4 }
 0x2ab   :  { %v510_v55 = vadd.f32 %v646_v53, %v509_v54 }
 0x2ad   :  { %v511_v56 = vrot.slane %v510_v55, 2 }
 0x2af   :  { %v512_v57 = vadd.f32 %v511_v56, %v510_v55 }
 0x2b1   :  { %v513_v58 = vrot.slane %v512_v57, 1 }
 0x2b3   :  { %v514_v59 = vadd.f32 %v513_v58, %v512_v57 }
 0x2b5   :  { %647 = vrcp.f32 %v514_v59 }
 0x2c2   :  { %v648_v60 = vpop.eup %647 }
 0x2c3   :  { %v516_v61 = vmul.f32 %v648_v60, %v646_v53 }
 0x2c5   :  { %v519_v63 = vsel %vm498_vm3, %v516_v61, %v518_v62 }
 0x2c6   :  { %520 = vst [vmem:[%s829_s7] sm:$0xff] %v519_v63 }

</bundles_post_ra>
